<compile_context>
chip_gen: v7x
topology: tpu7x:2x2x1
jax: 0.10.0
libtpu: 0.0.40
codegen_flags: <defaults>
</compile_context>

<pallas_src>
import math

import jax
import jax.numpy as jnp
from jax.experimental import pallas as pl
from jax.experimental.pallas import tpu as pltpu


_INV_SQRT2 = 1.0 / math.sqrt(2.0)
_LANES = 128


def _mlp_kernel(x_ref, wpack_ref, b2_ref, o_ref):
    # x:     (1, Bp)  batch on lanes, zero-padded to a multiple of 128
    # wpack: (H, 4)   columns: [w1 | b1 | w2 | unused]
    # b2:    (1,)     scalar in SMEM
    x = x_ref[...]                                        # (1, Bp)
    wpack = wpack_ref[...]                                # (H, 4)
    w1 = wpack[:, 0:1]                                    # (H, 1) static lane slice
    b1 = wpack[:, 1:2]                                    # (H, 1)
    w2 = wpack[:, 2:3]                                    # (H, 1)

    # Layer 1 (in_features == 1): outer product on the VPU, no MXU.
    h = w1 * x + b1                                       # (H,1)*(1,Bp)+(H,1) -> (H, Bp)
    # Exact (erf-based) GELU, matching torch.nn.functional.gelu default.
    h = 0.5 * h * (1.0 + jax.lax.erf(h * jnp.float32(_INV_SQRT2)))
    # Layer 2 (out_features == 1): VPU multiply + sublane reduce, no MXU.
    o = jnp.sum(h * w2, axis=0, keepdims=True) + b2_ref[0]  # (1, Bp)
    o_ref[...] = o.astype(o_ref.dtype)                    # one unmasked lane-dense store


def testnet_forward(x, w1, b1, w2, b2):
    """Forward pass of TestNet.

    x:  (B, 1)  float32
    w1: (H, 1)  torch-layout linear1.weight (out=H, in=1)
    b1: (H,)    linear1.bias
    w2: (1, H)  torch-layout linear2.weight (out=1, in=H)
    b2: (1,)    linear2.bias
    returns (B, 1) float32
    """
    B = x.shape[0]
    H = w1.shape[0]
    Bp = max(_LANES, pl.cdiv(B, _LANES) * _LANES)         # lane-pad batch to 128 multiple

    # Layout plumbing (pure reshapes/pads, outside the kernel): batch on lanes,
    # all three (H,1) parameter columns packed into one contiguous VMEM input.
    x_row = jnp.zeros((1, Bp), jnp.float32).at[0, :B].set(x[:, 0])
    wpack = jnp.concatenate(
        [w1.reshape(H, 1),
         b1.reshape(H, 1),
         w2.reshape(H, 1),
         jnp.zeros((H, 1), jnp.float32)], axis=1)          # (H, 4)
    b2_s = b2.reshape(1,)

    bytes_accessed = 4 * (x_row.size + wpack.size + b2_s.size + Bp)

    out_row = pl.pallas_call(
        _mlp_kernel,
        out_shape=jax.ShapeDtypeStruct((1, Bp), jnp.float32),
        in_specs=[
            pl.BlockSpec((1, Bp), lambda: (0, 0)),
            pl.BlockSpec((H, 4), lambda: (0, 0)),
            pl.BlockSpec(memory_space=pltpu.MemorySpace.SMEM),   # scalar b2
        ],
        out_specs=pl.BlockSpec((1, Bp), lambda: (0, 0)),
        cost_estimate=pl.CostEstimate(
            flops=4 * Bp * H,          # 2 muls + 2 adds per (lane, hidden) pair
            transcendentals=Bp * H,    # erf
            bytes_accessed=bytes_accessed),
    )(x_row, wpack, b2_s)

    return out_row[0, :B].reshape(B, 1)


def init_params(key, input_dim, output_dim, hidden=50):
    """Kaiming-normal weights (fan_in, gain=sqrt(2)), zero biases, torch layout."""
    k1, k2 = jax.random.split(key)
    w1 = jax.random.normal(k1, (hidden, input_dim), jnp.float32) * math.sqrt(2.0 / input_dim)
    w2 = jax.random.normal(k2, (output_dim, hidden), jnp.float32) * math.sqrt(2.0 / hidden)
    b1 = jnp.zeros((hidden,), jnp.float32)
    b2 = jnp.zeros((output_dim,), jnp.float32)
    return w1, b1, w2, b2


if __name__ == "__main__":
    batchsize = 64
    input_dim = 1
    output_dim = 1

    key = jax.random.PRNGKey(0)
    kx, kp = jax.random.split(key)
    x = jax.random.uniform(kx, (batchsize, input_dim), jnp.float32)
    w1, b1, w2, b2 = init_params(kp, input_dim, output_dim)

    out = testnet_forward(x, w1, b1, w2, b2)
    jax.block_until_ready(out)

    # Pure-JAX reference matching torch semantics: x @ W1.T + b1 -> GELU -> @ W2.T + b2.
    h_ref = x @ w1.T + b1
    h_ref = 0.5 * h_ref * (1.0 + jax.lax.erf(h_ref / jnp.sqrt(2.0)))
    ref = h_ref @ w2.T + b2

    assert out.shape == (batchsize, output_dim)
    assert jnp.allclose(out, ref, atol=1e-5, rtol=1e-5), float(jnp.max(jnp.abs(out - ref)))

    print("KERNEL_OK")
</pallas_src>

<mosaic_0001>
module attributes {stable_mosaic.version = 11 : i64} {
  func.func @_mlp_kernel(%arg0: memref<1x128xf32, #tpu.memory_space<vmem>>, %arg1: memref<50x4xf32, #tpu.memory_space<vmem>>, %arg2: memref<1xf32, #tpu.memory_space<smem>>, %arg3: memref<1x128xf32, #tpu.memory_space<vmem>>) attributes {dimension_semantics = [], scalar_prefetch = 0 : i64, scratch_operands = 0 : i64, tpu.core_type = #tpu.core_type<tc>} {
    %c0 = arith.constant 0 : index
    %c0_0 = arith.constant 0 : index
    %0 = vector.load %arg0[%c0, %c0_0] : memref<1x128xf32, #tpu.memory_space<vmem>>, vector<1x128xf32>
    %c0_1 = arith.constant 0 : index
    %c0_2 = arith.constant 0 : index
    %1 = vector.load %arg1[%c0_1, %c0_2] : memref<50x4xf32, #tpu.memory_space<vmem>>, vector<50x4xf32>
    %2 = vector.extract_strided_slice %1 {offsets = [0, 0], sizes = [50, 1], strides = [1, 1]} : vector<50x4xf32> to vector<50x1xf32>
    %3 = vector.extract_strided_slice %1 {offsets = [0, 1], sizes = [50, 1], strides = [1, 1]} : vector<50x4xf32> to vector<50x1xf32>
    %4 = vector.extract_strided_slice %1 {offsets = [0, 2], sizes = [50, 1], strides = [1, 1]} : vector<50x4xf32> to vector<50x1xf32>
    %5 = vector.broadcast %2 : vector<50x1xf32> to vector<50x128xf32>
    %6 = vector.broadcast %0 : vector<1x128xf32> to vector<50x128xf32>
    %7 = arith.mulf %5, %6 : vector<50x128xf32>
    %8 = vector.broadcast %3 : vector<50x1xf32> to vector<50x128xf32>
    %9 = arith.addf %7, %8 : vector<50x128xf32>
    %cst = arith.constant 5.000000e-01 : f32
    %10 = vector.broadcast %cst : f32 to vector<50x128xf32>
    %11 = arith.mulf %10, %9 : vector<50x128xf32>
    %cst_3 = arith.constant 0.707106769 : f32
    %12 = vector.broadcast %cst_3 : f32 to vector<50x128xf32>
    %13 = arith.mulf %9, %12 : vector<50x128xf32>
    %14 = math.erf %13 : vector<50x128xf32>
    %cst_4 = arith.constant 1.000000e+00 : f32
    %15 = vector.broadcast %cst_4 : f32 to vector<50x128xf32>
    %16 = arith.addf %15, %14 : vector<50x128xf32>
    %17 = arith.mulf %11, %16 : vector<50x128xf32>
    %18 = vector.broadcast %4 : vector<50x1xf32> to vector<50x128xf32>
    %19 = arith.mulf %17, %18 : vector<50x128xf32>
    %cst_5 = arith.constant dense<0.000000e+00> : vector<128xf32>
    %20 = vector.multi_reduction <add>, %19, %cst_5 [0] : vector<50x128xf32> to vector<128xf32>
    %21 = vector.shape_cast %20 : vector<128xf32> to vector<1x128xf32>
    %c0_6 = arith.constant 0 : index
    %22 = memref.load %arg2[%c0_6] : memref<1xf32, #tpu.memory_space<smem>>
    %23 = vector.broadcast %22 : f32 to vector<1x128xf32>
    %24 = arith.addf %21, %23 : vector<1x128xf32>
    %c0_7 = arith.constant 0 : index
    %c0_8 = arith.constant 0 : index
    %25 = vector.load %arg3[%c0_7, %c0_8] : memref<1x128xf32, #tpu.memory_space<vmem>>, vector<1x128xf32>
    tpu.vector_store %arg3[%c0_7, %c0_8], %24 {strides = array<i32>} : memref<1x128xf32, #tpu.memory_space<vmem>>, vector<1x128xf32>,
    return
  }
}

</mosaic_0001>

<bundles_post_ra>
// kernel: tpu_custom_call.1
= control target key start
LH: loop header
LB: loop body
LE: loop exit
PB: predicated region body
PF: predicated region fallthrough
CT: control target
= control target key end

     0   :  { %v263_v2 = vmov 1   ;;  %v264_v3 = vmov 0   ;;  %s326_s0 = inlined_call_operand.vmem [shape: f32[1,128], index: 0, kind: input, shape index: {}]   ;;  %s327_s1 = inlined_call_operand.vmem [shape: f32[50,4], index: 1, kind: input, shape index: {}]   ;;  %s328_s2 = inlined_call_operand.<no memory space> [shape: f32[1], index: 2, kind: input, shape index: {}]   ;;  %s329_s3 = inlined_call_operand.hbm [shape: f32[1,128], index: 3, kind: output, shape index: {}]  }
   0x1   :  { %v19_v0 = vld [vmem:[%s327_s1 + $0x10] sm:$0xff]  ;;  %v18_v1 = vld [vmem:[%s327_s1 + $0x8] sm:$0xff]  ;;  %216 = vset.pattern.permute.xlu0 %v263_v2  ;;  %214 = vset.pattern.permute.xlu1 %v264_v3 }
   0x2   :  { %36 = vperm.xlu1 %214, %v19_v0   ;;  %77 = vperm.xlu0 %216, %v18_v1  }
   0x3   :  { %9 = vsyncpa [#allocation4], 0  ;;  %v17_v4 = vld [vmem:[%s327_s1] sm:$0xff]  ;;  %v20_v5 = vld [vmem:[%s327_s1 + $0x18] sm:$0xff]  ;;  %v265_v9 = vmov 2   ;;  %vm182_vm0 = vcmask 1041408  }
   0x4   :  { %v21_v6 = vld [vmem:[%s327_s1 + $0x20] sm:$0xff]  ;;  %v23_v7 = vld [vmem:[%s327_s1 + $0x30] sm:$0x3]  ;;  %v22_v8 = vld [vmem:[%s327_s1 + $0x28] sm:$0xff]  ;;  %s266_s28 = smov [#allocation3]  }
   0x5   :  { %v209_v14 = vld [vmem:[%s326_s0] ss:$0 sm:$0xff]  ;;  %s201_s29 = sshll.u32 %s266_s28, 4  ;;  %s202_s29 = int_to_ptr.vmem [resolvable:$true] %s201_s29 }
   0x6   :  { %215 = vset.pattern.permute.xlu1 %v263_v2  ;;  %217 = vset.pattern.permute.xlu0 %v264_v3  ;;  %s239_s30 = scalar_lea.vmem %s202_s29, 16  ;;  %s243_s4 = scalar_lea.vmem %s202_s29, 32 }
   0x7   :  { %26 = vperm.xlu0 %217, %v17_v4   ;;  %73 = vperm.xlu1 %215, %v17_v4   ;;  %p240_p0 = scmp.ne.s32.totalorder %s202_s29, %s239_s30  ;;  %p244_p1 = scmp.lt.s32.totalorder %s202_s29, %s202_s29 }
   0x8   :  { %p245_p2 = scmp.lt.s32.totalorder %s243_s4, %s239_s30 }
   0xa   :  { %p246_p3 = por %p245_p2, %p244_p1 }
   0xb   :  { %31 = vperm.xlu0 %217, %v18_v1   ;;  %218 = vset.pattern.permute.xlu1 %v264_v3 }
   0xc   :  { %41 = vperm.xlu1 %218, %v20_v5   ;;  %p247_p4 = pnand %p246_p3, %p240_p0 }
   0xf   :  { %46 = vperm.xlu0 %217, %v21_v6  }
  0x10   :  { %219 = vset.pattern.permute.xlu1 %v263_v2 }
  0x11   :  { %81 = vperm.xlu1 %219, %v19_v0  }
  0x13   :  { %221 = vset.pattern.permute.xlu0 %v263_v2 }
  0x14   :  { %89 = vperm.xlu0 %221, %v21_v6  }
  0x15   :  { %85 = vperm.xlu1 %219, %v20_v5  }
  0x18   :  { %97 = vperm.xlu0 %221, %v23_v7  }
  0x19   :  { %220 = vset.pattern.permute.xlu1 %v264_v3 }
  0x1a   :  { %51 = vperm.xlu1 %220, %v22_v8  }
  0x1c   :  { %224 = vset.pattern.permute.xlu0 %v265_v9 }
  0x1d   :  { %147 = vperm.xlu0 %224, %v18_v1  }
  0x1e   :  { %56 = vperm.xlu1 %220, %v23_v7  }
  0x21   :  { %159 = vperm.xlu0 %224, %v21_v6  }
  0x22   :  { %222 = vset.pattern.permute.xlu1 %v263_v2 }
  0x23   :  { %93 = vperm.xlu1 %222, %v22_v8  }
  0x25   :  { %167 = vperm.xlu0 %224, %v23_v7  }
  0x27   :  { %223 = vset.pattern.permute.xlu1 %v265_v9 }
  0x28   :  { %143 = vperm.xlu1 %223, %v17_v4  }
  0x2c   :  { %151 = vperm.xlu1 %223, %v19_v0  }
  0x30   :  { %155 = vperm.xlu1 %223, %v20_v5  }
  0x34   :  { %163 = vperm.xlu1 %223, %v22_v8  }
  0x81   :  { %v37_v10 = vpop.permute.xlu1 %36  ;;  %v78_v11 = vpop.permute.xlu0 %77 }
  0x82   :  { %v67_v21 = vmul.f32 %v209_v14, %v37_v10 }
  0x86   :  { %v27_v12 = vpop.permute.xlu0 %26  ;;  %v74_v13 = vpop.permute.xlu1 %73 }
  0x87   :  { %v65_v15 = vmul.f32 %v209_v14, %v27_v12 }
  0x89   :  { %v100_v19 = vadd.f32 %v74_v13, %v65_v15 }
  0x8a   :  { %v32_v16 = vpop.permute.xlu0 %31 }
  0x8b   :  { %v66_v17 = vmul.f32 %v209_v14, %v32_v16  ;;  %v42_v18 = vpop.permute.xlu1 %41  ;;  %v114_v25 = vmul.f32 0.70710677, %v100_v19  ;;  %v107_v51 = vmul.f32 0.5, %v100_v19 }
  0x8c   :  { %v68_v27 = vmul.f32 %v209_v14, %v42_v18 }
  0x8d   :  { %v101_v22 = vadd.f32 %v78_v11, %v66_v17  ;;  %225 = verf.f32 %v114_v25 }
  0x8e   :  { %v47_v20 = vpop.permute.xlu0 %46 }
  0x8f   :  { %v115_v26 = vmul.f32 0.70710677, %v101_v22  ;;  %v69_v28 = vmul.f32 %v209_v14, %v47_v20  ;;  %v108_v52 = vmul.f32 0.5, %v101_v22 }
  0x90   :  { %v82_v23 = vpop.permute.xlu1 %81 }
  0x91   :  { %v102_v24 = vadd.f32 %v82_v23, %v67_v21  ;;  %227 = verf.f32 %v115_v26 }
  0x93   :  { %v90_v29 = vpop.permute.xlu0 %89  ;;  %v116_v31 = vmul.f32 0.70710677, %v102_v24  ;;  %v109_v56 = vmul.f32 0.5, %v102_v24 }
  0x94   :  { %v86_v30 = vpop.permute.xlu1 %85  ;;  %v104_v33 = vadd.f32 %v90_v29, %v69_v28 }
  0x95   :  { %v103_v32 = vadd.f32 %v86_v30, %v68_v27  ;;  %229 = verf.f32 %v116_v31 }
  0x96   :  { %v118_v36 = vmul.f32 0.70710677, %v104_v33  ;;  %v111_v6 = vmul.f32 0.5, %v104_v33 }
  0x97   :  { %v117_v34 = vmul.f32 0.70710677, %v103_v32  ;;  %v98_v39 = vpop.permute.xlu0 %97  ;;  %v226_v40 = vpop.eup %225  ;;  %v110_v1 = vmul.f32 0.5, %v103_v32 }
  0x98   :  { %v128_v49 = vadd.f32 1.0, %v226_v40 }
  0x99   :  { %v52_v35 = vpop.permute.xlu1 %51  ;;  %231 = verf.f32 %v117_v34 }
  0x9a   :  { %233 = verf.f32 %v118_v36  ;;  %v70_v43 = vmul.f32 %v209_v14, %v52_v35  ;;  %v135_v58 = vmul.f32 %v128_v49, %v107_v51  ;;  %v192_v36 = vstv %s328_s2 }
  0x9b   :  { %v228_v42 = vpop.eup %227 }
  0x9c   :  { %v129_v48 = vadd.f32 1.0, %v228_v42  ;;  %v148_v60 = vpop.permute.xlu0 %147 }
  0x9d   :  { %v57_v37 = vpop.permute.xlu1 %56 }
  0x9e   :  { %v71_v38 = vmul.f32 %v209_v14, %v57_v37  ;;  %v136_v57 = vmul.f32 %v129_v48, %v108_v52 }
  0x9f   :  { %v230_v46 = vpop.eup %229 }
  0xa0   :  { %v106_v41 = vadd.f32 %v98_v39, %v71_v38  ;;  %v130_v53 = vadd.f32 1.0, %v230_v46  ;;  %v171_v2 = vmul.f32 %v148_v60, %v136_v57  ;;  %v160_v12 = vpop.permute.xlu0 %159 }
  0xa2   :  { %v120_v44 = vmul.f32 0.70710677, %v106_v41  ;;  %v94_v45 = vpop.permute.xlu1 %93  ;;  %v137_v62 = vmul.f32 %v130_v53, %v109_v56  ;;  %v113_v9 = vmul.f32 0.5, %v106_v41 }
  0xa3   :  { %v105_v47 = vadd.f32 %v94_v45, %v70_v43  ;;  %v232_v54 = vpop.eup %231 }
  0xa4   :  { %235 = verf.f32 %v120_v44  ;;  %v234_v59 = vpop.eup %233  ;;  %v131_v63 = vadd.f32 1.0, %v232_v54  ;;  %v168_v22 = vpop.permute.xlu0 %167 }
  0xa5   :  { %v119_v50 = vmul.f32 0.70710677, %v105_v47  ;;  %v132_v3 = vadd.f32 1.0, %v234_v59  ;;  %v112_v18 = vmul.f32 0.5, %v105_v47 }
  0xa6   :  { %v138_v8 = vmul.f32 %v131_v63, %v110_v1 }
  0xa7   :  { %237 = verf.f32 %v119_v50  ;;  %v144_v55 = vpop.permute.xlu1 %143  ;;  %v139_v13 = vmul.f32 %v132_v3, %v111_v6 }
  0xa8   :  { %v170_v61 = vmul.f32 %v144_v55, %v135_v58 }
  0xa9   :  { %v174_v21 = vmul.f32 %v160_v12, %v139_v13 }
  0xaa   :  { %v177_v7 = vadd.f32 %v171_v2, %v170_v61 }
  0xab   :  { %v152_v0 = vpop.permute.xlu1 %151 }
  0xac   :  { %v172_v4 = vmul.f32 %v152_v0, %v137_v62 }
  0xae   :  { %v236_v5 = vpop.eup %235  ;;  %v178_v14 = vadd.f32 %v177_v7, %v172_v4 }
  0xaf   :  { %v134_v10 = vadd.f32 1.0, %v236_v5  ;;  %v156_v11 = vpop.permute.xlu1 %155 }
  0xb0   :  { %v173_v15 = vmul.f32 %v156_v11, %v138_v8 }
  0xb1   :  { %v238_v16 = vpop.eup %237  ;;  %v141_v17 = vmul.f32 %v134_v10, %v113_v9 }
  0xb2   :  { %v179_v19 = vadd.f32 %v178_v14, %v173_v15  ;;  %v133_v20 = vadd.f32 1.0, %v238_v16 }
  0xb3   :  { %v176_v24 = vmul.f32 %v168_v22, %v141_v17  ;;  %v164_v25 = vpop.permute.xlu1 %163 }
  0xb4   :  { %v140_v23 = vmul.f32 %v133_v20, %v112_v18  ;;  %v180_v27 = vadd.f32 %v179_v19, %v174_v21 }
  0xb5   :  { %v183_v29 = vsel %vm182_vm0, %v176_v24, 0.0 }
  0xb6   :  { %v175_v26 = vmul.f32 %v164_v25, %v140_v23 }
  0xb8   :  { %v181_v28 = vadd.f32 %v180_v27, %v175_v26 }
  0xba   :  { %v184_v30 = vadd.f32 %v183_v29, %v181_v28 }
  0xbc   :  { %v185_v31 = vrot.slane %v184_v30, 4 }
  0xbe   :  { %v186_v32 = vadd.f32 %v185_v31, %v184_v30 }
  0xc0   :  { %v187_v33 = vrot.slane %v186_v32, 2 }
  0xc2   :  { %v188_v34 = vadd.f32 %v187_v33, %v186_v32 }
  0xc4   :  { %v189_v35 = vrot.slane %v188_v34, 1 }
  0xc6   :  { %v190_v37 = vadd.f32 %v189_v35, %v188_v34 }
  0xc8   :  { %v193_v38 = vadd.f32 %v192_v36, %v190_v37 }
  0xca   :  { %194 = vst [vmem:[#allocation3] sm:$0x1] %v193_v38 }
  0xcb   :  { %250 = shalt.err (!%p247_p4)
}
  0xcc   :  { %s251_s7 = scalar_lea.hbm %s329_s3, 16 }
  0xcd   :  { %p252_p5 = scmp.ne.s32.totalorder %s329_s3, %s251_s7  ;;  %p255_p6 = scmp.lt.u32.totalorder %s251_s7, %s329_s3 }
  0xcf   :  { %p257_p7 = pnand %p255_p6, %p252_p5 }
  0xd1   :  { %260 = shalt.err (!%p257_p7)
}
  0xd2   :  { %204 = dma.vmem_to_hbm [thread:$0]  %s202_s29, 16, %s329_s3, [#allocation4]  }
  0xd3   :  { %261 = dma.done.wait [#allocation4], 16  }
  0xd4   :  { %262 = vsyncadd [#allocation4], 4294967280 }
  0xd5   :  { %208 = vsyncpa [#allocation4], 1 }

</bundles_post_ra>
